<compile_context>
chip_gen: v7x
topology: tpu7x:2x2x1
jax: 0.10.0
libtpu: 0.0.40
codegen_flags: <defaults>
</compile_context>

<pallas_src>
import jax
import jax.numpy as jnp
from jax.experimental import pallas as pl
from jax.experimental.pallas import tpu as pltpu


def _cdiv(a, b):
    return -(-a // b)


def _round_up(x, m):
    return _cdiv(x, m) * m


# ---------------------------------------------------------------------------
# Pallas kernel: fused identity matmul + in-kernel prior reconstruction
#   out[n, p] = relu( sum_c W[n,c]*x[c,p] + sum_k Y[n,k]*M[k,p] + b[n] )
# ---------------------------------------------------------------------------
def _psp_fused_kernel(x_ref, w_ref, y_ref, m_ref, b_ref, o_ref):
    # x_ref: (1, C, THW)    activations (NCHW native, spatial flattened)
    # w_ref: (N, C)         identity slice of the bottleneck weight (resident)
    # y_ref: (1, N, S2)     block-diagonal mixed pooled pyramid (resident/batch)
    # m_ref: (S2, THW)      Kronecker bilinear-upsample matrix tile
    # b_ref: (N, 1)         bias (f32)
    # o_ref: (1, N, THW)
    acc = jnp.dot(w_ref[...], x_ref[0], preferred_element_type=jnp.float32)
    acc = acc + jnp.dot(y_ref[0], m_ref[...], preferred_element_type=jnp.float32)
    acc = acc + b_ref[...]
    o_ref[0] = jnp.maximum(acc, 0.0).astype(o_ref.dtype)


def _pick_tile_and_vmem(B, C, N, S2, HW, esz, block_hw):
    """Derive the spatial tile (lanes) and vmem_limit from the VMEM budget."""
    try:
        cap = int(pltpu.get_tpu_info().vmem_capacity_bytes)
        if cap <= 0:
            raise ValueError("bad vmem capacity")
    except Exception:
        cap = 64 * 1024 * 1024  # conservative fallback: v7x per-TensorCore VMEM
    budget = min((cap * 3) // 4, 100 * 1024 * 1024)  # leave Mosaic headroom

    # Double-buffered resident operands (W, Y) + bias; streamed tiles per lane.
    resident = 2 * (N * C + N * S2) * esz + 2 * N * 4
    per_lane = 2 * (C + S2 + N) * esz
    avail = budget - resident - (4 << 20)
    max_thw = 128
    if avail > per_lane * 128:
        max_thw = min(2048, (avail // per_lane) // 128 * 128)

    if block_hw is not None:
        thw = min(block_hw, HW)
        assert thw == HW or thw % 128 == 0, "block_hw must be a multiple of 128"
    else:
        thw = HW if HW <= max_thw else max_thw
        # Keep >= 2 grid steps so both v7x TensorCores get work (batch-1 case).
        if B * _cdiv(HW, thw) < 2 and HW > 128:
            thw = min(thw, _round_up(_cdiv(HW, 2), 128))

    need = resident + per_lane * thw + (4 << 20)
    vmem_limit = int(min(max(need, 32 << 20), 128 << 20))
    return thw, vmem_limit


def _fused_psp_bottleneck(x, w_id, y_flat, m, b, *, block_hw=None,
                          compute_dtype=jnp.bfloat16):
    """x: (B,C,HW), w_id: (N,C), y_flat: (B,N,S2), m: (S2,HW), b: (N,)."""
    B, C, HW = x.shape
    N, Cw = w_id.shape
    S2 = m.shape[0]
    assert Cw == C and y_flat.shape == (B, N, S2)
    assert m.shape == (S2, HW) and b.shape == (N,)

    esz = jnp.dtype(compute_dtype).itemsize
    thw, vmem_limit = _pick_tile_and_vmem(B, C, N, S2, HW, esz, block_hw)
    nt = _cdiv(HW, thw)

    xk = x.astype(compute_dtype)
    wk = w_id.astype(compute_dtype)
    yk = y_flat.astype(compute_dtype)
    mk = m.astype(compute_dtype)
    bk = b.reshape(N, 1).astype(jnp.float32)   # bias add stays exact f32

    return pl.pallas_call(
        _psp_fused_kernel,
        out_shape=jax.ShapeDtypeStruct((B, N, HW), compute_dtype),
        grid_spec=pltpu.PrefetchScalarGridSpec(
            num_scalar_prefetch=0,
            grid=(B, nt),
            in_specs=[
                pl.BlockSpec((1, C, thw), lambda bi, ti: (bi, 0, ti)),
                pl.BlockSpec((N, C), lambda bi, ti: (0, 0)),
                pl.BlockSpec((1, N, S2), lambda bi, ti: (bi, 0, 0)),
                pl.BlockSpec((S2, thw), lambda bi, ti: (0, ti)),
                pl.BlockSpec((N, 1), lambda bi, ti: (0, 0)),
            ],
            out_specs=pl.BlockSpec((1, N, thw), lambda bi, ti: (bi, 0, ti)),
        ),
        compiler_params=pltpu.CompilerParams(
            dimension_semantics=("parallel", "parallel"),
            vmem_limit_bytes=vmem_limit,
        ),
    )(xk, wk, yk, mk, bk)


# ---------------------------------------------------------------------------
# Exact PyTorch-semantics helper matrices (tiny, plain JAX)
# ---------------------------------------------------------------------------
def adaptive_avg_pool_matrix(in_size, out_size):
    """P (out, in): pooled = P @ x reproduces AdaptiveAvgPool bins exactly."""
    i = jnp.arange(out_size)
    start = (i * in_size) // out_size
    end = ((i + 1) * in_size + out_size - 1) // out_size
    j = jnp.arange(in_size)
    mask = (j[None, :] >= start[:, None]) & (j[None, :] < end[:, None])
    counts = (end - start).astype(jnp.float32)
    return mask.astype(jnp.float32) / counts[:, None]


def bilinear_upsample_matrix(in_size, out_size):
    """U (out, in): bilinear interpolation weights, align_corners=False."""
    o = jnp.arange(out_size, dtype=jnp.float32)
    scale = in_size / out_size
    src = jnp.maximum(0.0, (o + 0.5) * scale - 0.5)
    i0 = jnp.minimum(jnp.floor(src).astype(jnp.int32), in_size - 1)
    i1 = jnp.minimum(i0 + 1, in_size - 1)
    w1 = src - i0.astype(jnp.float32)
    w0 = 1.0 - w1
    U = jnp.zeros((out_size, in_size), jnp.float32)
    U = U.at[jnp.arange(out_size), i0].add(w0)
    U = U.at[jnp.arange(out_size), i1].add(w1)
    return U


# ---------------------------------------------------------------------------
# PSPModule forward (folded + fully fused)
# ---------------------------------------------------------------------------
def psp_forward(feats, stage_weights, bneck_w, bneck_b, sizes=(1, 2, 3, 6),
                *, block_hw=None, compute_dtype=jnp.bfloat16):
    """PSPModule forward.

    feats:         (B, C, H, W) NCHW.
    stage_weights: stage_weights[i] is (C, C), input-major
                   (PyTorch conv weight (out, in, 1, 1) -> [in, out]).
    bneck_w:       (C*(len(sizes)+1), out_features), input-major; row blocks
                   ordered [stage_0 ... stage_{S-1}, identity] to match
                   torch.cat(priors, 1).
    bneck_b:       (out_features,).
    """
    B, C, H, W = feats.shape
    S = len(sizes)
    assert len(stage_weights) == S
    Ctot, N = bneck_w.shape
    assert Ctot == C * (S + 1)
    S_tot = int(sum(sizes))
    S2 = S_tot * S_tot

    feats = feats.astype(jnp.float32)
    bneck_w = bneck_w.astype(jnp.float32)

    # Fold each stage's 1x1 conv into its bottleneck slice, mix channels at
    # pooled (s x s) resolution, and pack everything into one block-diagonal
    # Y (B, N, 12, 12) plus concatenated upsample matrices. All tiny, exact f32.
    Y = jnp.zeros((B, N, S_tot, S_tot), jnp.float32)
    uh_parts, uw_parts = [], []
    off = 0
    for idx, s in enumerate(sizes):
        w_fold = stage_weights[idx].astype(jnp.float32) @ bneck_w[idx * C:(idx + 1) * C]
        Ph = adaptive_avg_pool_matrix(H, s)                       # (s, H)
        Pw = adaptive_avg_pool_matrix(W, s)                       # (s, W)
        pooled = jnp.einsum("ih,bchw,jw->bcij", Ph, feats, Pw)    # (B, C, s, s)
        y_s = jnp.einsum("bcij,cn->bnij", pooled, w_fold)         # (B, N, s, s)
        Y = Y.at[:, :, off:off + s, off:off + s].set(y_s)
        uh_parts.append(bilinear_upsample_matrix(s, H))           # (H, s)
        uw_parts.append(bilinear_upsample_matrix(s, W))           # (W, s)
        off += s
    Uh = jnp.concatenate(uh_parts, axis=1)                        # (H, S_tot)
    Uw = jnp.concatenate(uw_parts, axis=1)                        # (W, S_tot)

    # Kronecker upsample matrix: prior[b,n,hw] = sum_k Y_flat[b,n,k] * M[k,hw]
    M = jnp.einsum("hi,wj->ijhw", Uh, Uw).reshape(S2, H * W)      # (S2, H*W)
    Y_flat = Y.reshape(B, N, S2)

    # Identity branch weight (feats is the last concat slice).
    w_id = bneck_w[S * C:].T                                      # (N, C)

    out = _fused_psp_bottleneck(
        feats.reshape(B, C, H * W), w_id, Y_flat, M,
        bneck_b.astype(jnp.float32),
        block_hw=block_hw, compute_dtype=compute_dtype)
    return out.reshape(B, N, H, W)


# ---------------------------------------------------------------------------
# Pure-JAX reference: original (unfolded) concat structure, for checking
# ---------------------------------------------------------------------------
def psp_forward_ref(feats, stage_weights, bneck_w, bneck_b, sizes=(1, 2, 3, 6)):
    B, C, H, W = feats.shape
    priors = []
    for s, w_s in zip(sizes, stage_weights):
        Ph = adaptive_avg_pool_matrix(H, s)
        Pw = adaptive_avg_pool_matrix(W, s)
        pooled = jnp.einsum("ih,bchw,jw->bcij", Ph, feats, Pw)
        y = jnp.einsum("bcij,cd->bdij", pooled, w_s)
        Uh = bilinear_upsample_matrix(s, H)
        Uw = bilinear_upsample_matrix(s, W)
        priors.append(jnp.einsum("hi,bcij,wj->bchw", Uh, y, Uw))
    priors.append(feats)
    cat = jnp.concatenate(priors, axis=1)
    out = jnp.einsum("bchw,cd->bdhw", cat, bneck_w) + bneck_b[None, :, None, None]
    return jnp.maximum(out, 0.0)


if __name__ == "__main__":
    # Small shapes consistent with the module: B=2, features=4, H=W=16,
    # out_features=32, sizes=(1, 2, 3, 6).
    B, C, H, W = 2, 4, 16, 16
    out_features = 32
    sizes = (1, 2, 3, 6)

    key = jax.random.PRNGKey(0)
    k_x, k_s, k_w, k_b = jax.random.split(key, 4)

    feats = jax.random.normal(k_x, (B, C, H, W), dtype=jnp.float32)

    # Deterministic synthetic parameters, stored pre-transposed for matmul:
    # PyTorch conv weight (out, in, 1, 1) -> here (in, out).
    stage_keys = jax.random.split(k_s, len(sizes))
    stage_weights = [jax.random.normal(sk, (C, C), jnp.float32) * 0.1
                     for sk in stage_keys]
    Ctot = C * (len(sizes) + 1)
    bneck_w = jax.random.normal(k_w, (Ctot, out_features), jnp.float32) * 0.1
    bneck_b = jax.random.normal(k_b, (out_features,), jnp.float32) * 0.1

    ref = jax.block_until_ready(
        psp_forward_ref(feats, stage_weights, bneck_w, bneck_b, sizes))

    # f32-stream path, auto tile (HW=256 -> one full-extent spatial block per
    # image, grid (2, 1), both axes parallel).
    out_f32 = jax.block_until_ready(
        psp_forward(feats, stage_weights, bneck_w, bneck_b, sizes,
                    compute_dtype=jnp.float32))
    assert out_f32.shape == (B, out_features, H, W), out_f32.shape
    assert jnp.allclose(out_f32, ref, atol=2e-3, rtol=2e-3), "mismatch (f32)"

    # Default bf16-stream path with an explicit multi-tile lane-dense grid
    # (grid = (B, HW // 128) = (2, 2)); looser tolerance for bf16 inputs.
    out_bf16 = jax.block_until_ready(
        psp_forward(feats, stage_weights, bneck_w, bneck_b, sizes,
                    block_hw=128))
    assert out_bf16.shape == (B, out_features, H, W), out_bf16.shape
    assert jnp.allclose(out_bf16.astype(jnp.float32), ref,
                        atol=5e-2, rtol=5e-2), "mismatch (bf16 tiled)"

    print("KERNEL_OK")
</pallas_src>

<mosaic_0001>
module attributes {stable_mosaic.version = 11 : i64} {
  func.func @_psp_fused_kernel(%arg0: i32, %arg1: i32, %arg2: memref<1x4x256xf32, #tpu.memory_space<vmem>>, %arg3: memref<32x4xf32, #tpu.memory_space<vmem>>, %arg4: memref<1x32x144xf32, #tpu.memory_space<vmem>>, %arg5: memref<144x256xf32, #tpu.memory_space<vmem>>, %arg6: memref<32x1xf32, #tpu.memory_space<vmem>>, %arg7: memref<1x32x256xf32, #tpu.memory_space<vmem>>) attributes {dimension_semantics = [#tpu.dimension_semantics<parallel>, #tpu.dimension_semantics<parallel>], iteration_bounds = array<i64: 2, 1>, scalar_prefetch = 0 : i64, scratch_operands = 0 : i64, tpu.core_type = #tpu.core_type<tc>, window_params = [{transform_indices = @transform_0, window_bounds = array<i64: 1, 4, 256>}, {pipeline_mode = #tpu.pipeline_mode<synchronous>, transform_indices = @transform_1, window_bounds = array<i64: 32, 4>}, {transform_indices = @transform_2, window_bounds = array<i64: 1, 32, 144>}, {transform_indices = @transform_3, window_bounds = array<i64: 144, 256>}, {pipeline_mode = #tpu.pipeline_mode<synchronous>, transform_indices = @transform_4, window_bounds = array<i64: 32, 1>}, {transform_indices = @transform_5, window_bounds = array<i64: 1, 32, 256>}]} {
    %c0 = arith.constant 0 : index
    %c0_0 = arith.constant 0 : index
    %0 = vector.load %arg3[%c0, %c0_0] : memref<32x4xf32, #tpu.memory_space<vmem>>, vector<32x4xf32>
    %c0_1 = arith.constant 0 : index
    %c0_2 = arith.constant 0 : index
    %c0_3 = arith.constant 0 : index
    %1 = vector.load %arg2[%c0_1, %c0_2, %c0_3] : memref<1x4x256xf32, #tpu.memory_space<vmem>>, vector<1x4x256xf32>
    %2 = vector.shape_cast %1 : vector<1x4x256xf32> to vector<4x256xf32>
    %cst = arith.constant dense<0.000000e+00> : vector<32x256xf32>
    %3 = tpu.matmul %0, %2, %cst {dimension_numbers = #tpu.dot_dimension_numbers<[1], [0], [0], [1], [0, 0, 1, 1], [], []>} : vector<32x4xf32>, vector<4x256xf32>, vector<32x256xf32> -> vector<32x256xf32>
    %c0_4 = arith.constant 0 : index
    %c0_5 = arith.constant 0 : index
    %c0_6 = arith.constant 0 : index
    %4 = vector.load %arg4[%c0_4, %c0_5, %c0_6] : memref<1x32x144xf32, #tpu.memory_space<vmem>>, vector<1x32x144xf32>
    %5 = vector.shape_cast %4 : vector<1x32x144xf32> to vector<32x144xf32>
    %c0_7 = arith.constant 0 : index
    %c0_8 = arith.constant 0 : index
    %6 = vector.load %arg5[%c0_7, %c0_8] : memref<144x256xf32, #tpu.memory_space<vmem>>, vector<144x256xf32>
    %cst_9 = arith.constant dense<0.000000e+00> : vector<32x256xf32>
    %7 = tpu.matmul %5, %6, %cst_9 {dimension_numbers = #tpu.dot_dimension_numbers<[1], [0], [0], [1], [0, 0, 1, 1], [], []>} : vector<32x144xf32>, vector<144x256xf32>, vector<32x256xf32> -> vector<32x256xf32>
    %8 = arith.addf %3, %7 : vector<32x256xf32>
    %c0_10 = arith.constant 0 : index
    %c0_11 = arith.constant 0 : index
    %9 = vector.load %arg6[%c0_10, %c0_11] : memref<32x1xf32, #tpu.memory_space<vmem>>, vector<32x1xf32>
    %10 = vector.broadcast %9 : vector<32x1xf32> to vector<32x256xf32>
    %11 = arith.addf %8, %10 : vector<32x256xf32>
    %cst_12 = arith.constant 0.000000e+00 : f32
    %12 = vector.broadcast %cst_12 : f32 to vector<32x256xf32>
    %13 = arith.maximumf %11, %12 : vector<32x256xf32>
    %c0_13 = arith.constant 0 : index
    %c0_14 = arith.constant 0 : index
    %c0_15 = arith.constant 0 : index
    %14 = vector.load %arg7[%c0_13, %c0_14, %c0_15] : memref<1x32x256xf32, #tpu.memory_space<vmem>>, vector<1x32x256xf32>
    %15 = vector.shape_cast %14 : vector<1x32x256xf32> to vector<32x256xf32>
    %16 = vector.shape_cast %13 : vector<32x256xf32> to vector<1x32x256xf32>
    tpu.vector_store %arg7[%c0_13, %c0_14, %c0_15], %16 {strides = array<i32>} : memref<1x32x256xf32, #tpu.memory_space<vmem>>, vector<1x32x256xf32>,
    return
  }
  func.func @transform_0(%arg0: i32, %arg1: i32) -> (i32, i32, i32) {
    %c0_i32 = arith.constant 0 : i32
    %c0_i32_0 = arith.constant 0 : i32
    return %arg0, %c0_i32, %arg1 : i32, i32, i32
  }
  func.func @transform_1(%arg0: i32, %arg1: i32) -> (i32, i32) {
    %c0_i32 = arith.constant 0 : i32
    %c0_i32_0 = arith.constant 0 : i32
    %c0_i32_1 = arith.constant 0 : i32
    return %c0_i32, %c0_i32_0 : i32, i32
  }
  func.func @transform_2(%arg0: i32, %arg1: i32) -> (i32, i32, i32) {
    %c0_i32 = arith.constant 0 : i32
    %c0_i32_0 = arith.constant 0 : i32
    %c0_i32_1 = arith.constant 0 : i32
    return %arg0, %c0_i32, %c0_i32_0 : i32, i32, i32
  }
  func.func @transform_3(%arg0: i32, %arg1: i32) -> (i32, i32) {
    %c0_i32 = arith.constant 0 : i32
    %c0_i32_0 = arith.constant 0 : i32
    return %c0_i32, %arg1 : i32, i32
  }
  func.func @transform_4(%arg0: i32, %arg1: i32) -> (i32, i32) {
    %c0_i32 = arith.constant 0 : i32
    %c0_i32_0 = arith.constant 0 : i32
    %c0_i32_1 = arith.constant 0 : i32
    return %c0_i32, %c0_i32_0 : i32, i32
  }
  func.func @transform_5(%arg0: i32, %arg1: i32) -> (i32, i32, i32) {
    %c0_i32 = arith.constant 0 : i32
    %c0_i32_0 = arith.constant 0 : i32
    return %arg0, %c0_i32, %arg1 : i32, i32, i32
  }
}

</mosaic_0001>

<bundles_post_ra>
// kernel: tpu_custom_call.1
= control target key start
LH: loop header
LB: loop body
LE: loop exit
PB: predicated region body
PF: predicated region fallthrough
CT: control target
= control target key end

     0   :  { %10 = vsyncpa [#allocation3], 0  ;;  %s1390_s0 = inlined_call_operand.vmem [shape: f32[2,4,256], index: 0, kind: input, shape index: {}]   ;;  %s1391_s1 = inlined_call_operand.vmem [shape: f32[32,4], index: 1, kind: input, shape index: {}]   ;;  %s1392_s2 = inlined_call_operand.hbm [shape: f32[2,32,144], index: 2, kind: input, shape index: {}]   ;;  %s1393_s3 = inlined_call_operand.hbm [shape: f32[144,256], index: 3, kind: input, shape index: {}]   ;;  %s1394_s4 = inlined_call_operand.vmem [shape: f32[32,1], index: 4, kind: input, shape index: {}]   ;;  %s1395_s5 = inlined_call_operand.hbm [shape: f32[2,32,256], index: 5, kind: output, shape index: {}]  }
   0x1   :  { %12 = vsyncpa [#allocation3 + $0x1], 0 }
   0x2   :  { %13 = vsyncpa [#allocation6], 0 }
   0x3   :  { %14 = vsyncpa [#allocation4], 0 }
   0x4   :  { %16 = vsyncpa [#allocation4 + $0x1], 0  ;;  %s1099_s18 = smov 0   ;;  %s1101_s19 = smov 0  }
   0x5   :  { %s1103_s20 = smov 0   ;;  %s1105_s21 = smov 0  }
   0x6   :  { %s1107_s22 = smov 0   ;;  %s1109_s23 = smov 0  }
   0x7 LB: > { %s756_s24 = sadd.s32 4294967295, %s1058_s23   ;;  %s757_s25 = sadd.s32 4294967294, %s1058_s23   ;;  %s1058_s23 = sphi %s1109_s23, %s22_s23   ;;  %s1054_s22 = sphi %s1107_s22, %s1421_s22   ;;  %s1050_s21 = sphi %s1105_s21, %s1420_s21   ;;  %s1046_s20 = sphi %s1103_s20, %s1419_s20   ;;  %s1042_s19 = sphi %s1101_s19, %s1418_s19   ;;  %s1038_s18 = sphi %s1099_s18, %s1417_s18  }
   0x8   : > { %p103_p0 = scmp.ne.s32.totalorder %s1042_s19, %s1038_s18  ;;  %p1133_p1 = scmp.eq.s32.totalorder %s756_s24, 0 }
   0x9   : > { %p1137_p2 = scmp.eq.s32.totalorder %s756_s24, 1  ;;  %p182_p3 = scmp.eq.s32.totalorder %s757_s25, 1 }
   0xa   : > { %s1401_s26 = scalar_select %p1133_p1, 1, 0 }
   0xb   : > { %s1402_s27 = scalar_select %p1137_p2, 1, 0 }
   0xc   : > { %p1143_p4 = por %p1133_p1, %p103_p0  ;;  %p758_p5 = scmp.ge.s32.totalorder %s1058_s23, 1 }
   0xd   : > { %p1148_p6 = por %p182_p3, %p103_p0  ;;  %p189_p7 = scmp.lt.s32.totalorder %s1058_s23, 3 }
   0xe   : > { %s1403_s28 = scalar_select %p1143_p4, 1, 0 }
   0xf   : > { %s1404_s29 = scalar_select %p1148_p6, 1, 0 }
  0x10   : > { %p1153_p8 = pnand %p758_p5, %p189_p7  ;;  %s1060_s6 = smov [#allocation5]  }
  0x11   : > { %s207_s7 = sshll.u32 %s1060_s6, 4  ;;  %s34_s9 = sadd.s32 1, %s1054_s22  ;;  %s208_s7 = int_to_ptr.vmem [resolvable:$true] %s207_s7 }
  0x12   : > { %s1405_s30 = scalar_select %p1153_p8, 1, 0 }
  0x13   : > { %p840_p9 = pneg %p1153_p8  ;;  %s914_s12 = scalar_lea.hbm %s1393_s3, 4608 }
  0x14   : > { %p915_p12 = scmp.ne.s32.totalorder %s1393_s3, %s914_s12  ;;  %p921_p5 = scmp.lt.u32.totalorder %s914_s12, %s1393_s3 }
  0x15   : > { %p1162_p11 = pnand %p840_p9, %p1133_p1 }
  0x17   : > { %p916_p13 = pneg %p1162_p11 }
  0x19   : > { %p917_p0 = pnand %p916_p13, %p915_p12 }
  0x1b   : > { %p918_p3 = pneg %p917_p0 }
  0x1d   : > { %p923_p7 = pnand %p921_p5, %p918_p3 }
  0x1f   : > { %926 = shalt.err (!%p923_p7)
}
  0x20   : > { %s927_s17 = scalar_lea.vmem %s208_s7, 4608  ;;  %p935_p1 = scmp.lt.s32.totalorder %s208_s7, %s208_s7 }
  0x21   : > { %p928_p9 = scmp.ne.s32.totalorder %s208_s7, %s927_s17  ;;  %p936_p4 = scmp.lt.s32.totalorder %s927_s17, %s927_s17 }
  0x23   : > { %p930_p10 = pnand %p928_p9, %p916_p13  ;;  %p937_p8 = por %p936_p4, %p935_p1 }
  0x25   : > { %p931_p6 = pneg %p930_p10 }
  0x27   : > { %p938_p2 = pnand %p937_p8, %p931_p6 }
  0x29   : > { %941 = shalt.err (!%p938_p2)
}
  0x2a   : > { %s1400_s24 = smov 256   ;;  %s1062_s25 = smov 16  }
  0x2b   : > { %843 = dma.hbm_to_vmem [thread:$0]  (!%p1162_p11), %s1393_s3, 4608, %s208_s7, [#allocation6], %s1400_s24, %s1400_s24, %s1062_s25  }
  0x2c   : > { %p36_p1 = scmp.ge.s32.totalorder %s34_s9, 2  ;;  %s90_s11 = sadd.s32 1, %s1046_s20 }
  0x2d   : > { %p97_p2 = scmp.ne.s32.totalorder %s1046_s20, %s1042_s19  ;;  %p98_p4 = scmp.eq.s32.totalorder %s1058_s23, 0 }
  0x2e   : > { %s1423_s9 = smov (%p36_p1, %s34_s9), 0  ;;  %p1408_p8 = scmp.ne.s32.totalorder %s1402_s27, 0 }
  0x2f   : > { %p1192_p6 = por %p98_p4, %p97_p2  ;;  %s87_s13 = ssub.s32 %s1054_s22, %s1423_s9 }
  0x30   : > { %p1198_p10 = por %p1408_p8, %p97_p2  ;;  %p853_p12 = scmp.lt.s32.totalorder %s1058_s23, 2 }
  0x31   : > { %p88_p11 = scmp.eq.s32.totalorder %s87_s13, 0  ;;  %s237_s7 = sand.u32 1, %s1046_s20  }
  0x32   : > { %s761_s14 = sshll.u32 %s237_s7, 6  ;;  %s785_s16 = sshll.u32 %s1054_s22, 10 }
  0x33   : > { %s1207_s15 = scalar_select %p88_p11, %s1046_s20, %s90_s11  }
  0x34   : > { %s1213_s10 = scalar_lea.hbm %s1392_s2, %s785_s16  ;;  %s241_s27 = scalar_lea.vmem [#allocation2], %s761_s14 }
  0x35   : > { %s248_s24 = sshll.u32 %s241_s27, 4  ;;  %p1219_p13 = pnand %p853_p12, %p1192_p6  ;;  %s1215_s24 = int_to_ptr.vmem [resolvable:$true] %s248_s24 }
  0x36   : > { %s1223_s11 = scalar_lea.sflag [#allocation3], %s237_s7  ;;  %s942_s17 = scalar_lea.hbm %s1213_s10, 1024 }
  0x37   : > { %p943_p0 = scmp.ne.s32.totalorder %s1213_s10, %s942_s17  ;;  %p944_p3 = pneg %p1219_p13 }
  0x38   : > { %s947_s12 = scalar_lea.hbm %s1392_s2, 2048  ;;  %p948_p9 = scmp.lt.u32.totalorder %s1213_s10, %s1392_s2 }
  0x39   : > { %p945_p5 = pnand %p944_p3, %p943_p0  ;;  %p949_p1 = scmp.lt.u32.totalorder %s947_s12, %s942_s17 }
  0x3a   : > { %p951_p4 = scmp.lt.u32.totalorder %s942_s17, %s1213_s10 }
  0x3b   : > { %p946_p7 = pneg %p945_p5  ;;  %p950_p2 = por %p949_p1, %p948_p9 }
  0x3d   : > { %p952_p6 = por %p951_p4, %p950_p2 }
  0x3f   : > { %p953_p8 = pnand %p952_p6, %p946_p7 }
  0x41   : > { %956 = shalt.err (!%p953_p8)
}
  0x42   : > { %s957_s7 = scalar_lea.vmem %s1215_s24, 1024  ;;  %s1063_s14 = smov [#allocation2]  }
  0x43   : > { %p958_p12 = scmp.ne.s32.totalorder %s1215_s24, %s957_s7  ;;  %s962_s16 = sshll.u32 %s1063_s14, 4  ;;  %s963_s16 = int_to_ptr.vmem [resolvable:$false] %s962_s16 }
  0x44   : > { %s964_s6 = scalar_lea.vmem %s963_s16, 2048  ;;  %p965_p5 = scmp.lt.s32.totalorder %s1215_s24, %s963_s16 }
  0x45   : > { %p960_p11 = pnand %p958_p12, %p944_p3  ;;  %p966_p9 = scmp.lt.s32.totalorder %s964_s6, %s957_s7 }
  0x47   : > { %p961_p0 = pneg %p960_p11  ;;  %p967_p1 = por %p966_p9, %p965_p5 }
  0x49   : > { %p968_p2 = pnand %p967_p1, %p961_p0 }
  0x4b   : > { %971 = shalt.err (!%p968_p2)
}
  0x4c   : > { %s1411_s17 = smov 256   ;;  %p1412_p3 = scmp.ne.s32.totalorder %s1405_s30, 0 }
  0x4d   : > { %847 = dma.hbm_to_vmem [thread:$0]  (!%p1219_p13), %s1213_s10, 1024, %s1215_s24, %s1223_s11, %s1411_s17, %s1411_s17, %s1062_s25  }
  0x4e   : > { %260 = sbr.rel (%p1412_p3) target bundleno = 375 (0x177), region = 40  ;;  %s1257_s12 = sand.u32 (!%p1412_p3), 1, %s1042_s19  }
  0x4f   : > { %s765_s27 = sshll.u32 (!%p1412_p3), %s1257_s12, 6  ;;  %s263_s7 = scalar_lea.sflag (!%p1412_p3), [#allocation3], %s1257_s12 }
  0x50   : > { %s1263_s13 = scalar_lea.vmem (!%p1412_p3), [#allocation2], %s765_s27  ;;  %p1413_p7 = scmp.ne.s32.totalorder (!%p1412_p3), %s1403_s28, 0 }
  0x55   : > { %1025 = dma.done.wait (%p1413_p7), %s263_s7, 1024  }
  0x56   : > { %1027 = vsyncadd (%p1413_p7), %s263_s7, 4294966272  ;;  %p1414_p13 = scmp.ne.s32.totalorder %s1401_s26, 0 }
  0x58   : > { %1029 = dma.done.wait (%p1414_p13), [#allocation6], 4608  }
  0x59   : > { %1031 = vsyncadd (%p1414_p13), [#allocation6], 4294962688  ;;  %v1064_v0 = vmov 0.0   ;;  %v1065_v1 = vmov 0   ;;  %p307_p4 = scmp.lt.s32.totalorder %s1050_s21, 1  ;;  %v332_v2 = vld [vmem:[#allocation5 + $0x8] sm:$0xff] }
  0x5a   : > { %553 = vmatprep.mubr.f32.mxu0 %v1064_v0  ;;  %911 = vset.pattern.permute.xlu0 %v1065_v1  ;;  %v334_v3 = vld [vmem:[#allocation5 + $0x18] sm:$0xff]  ;;  %v331_v4 = vld [vmem:[#allocation5] sm:$0xff]  ;;  %v333_v6 = vld [vmem:[#allocation5 + $0x10] sm:$0xff]  ;;  %vm367_vm0 = vcmask 130048   ;;  %vm484_vm1 = vcmask 1043456   ;;  %vm471_vm2 = vcmask 31744  }
  0x5b   : > { %912 = vset.pattern.permute.xlu1 %v1065_v1  ;;  %v788_v5 = vpack.c.bf16 %v334_v3, %v332_v2  ;;  %v336_v7 = vld [vmem:[#allocation5 + $0x28] sm:$0xff]  ;;  %v338_v8 = vld [vmem:[#allocation5 + $0x38] sm:$0xff]  ;;  %v790_v9 = vpack.c.bf16 %v333_v6, %v331_v4  ;;  %v335_v11 = vld [vmem:[#allocation5 + $0x20] sm:$0xff]  ;;  %s308_s26 = scalar_select %p307_p4, %s1050_s21, 1 }
  0x5c   : > { %v792_v10 = vpack.c.bf16 %v338_v8, %v336_v7  ;;  %v337_v12 = vld [vmem:[#allocation5 + $0x30] sm:$0xff]  ;;  %v340_v13 = vld [vmem:[#allocation5 + $0x48] sm:$0xff]  ;;  %v342_v14 = vld [vmem:[#allocation5 + $0x58] sm:$0xff]  ;;  %s787_s6 = sshll.u32 %s1050_s21, 10  ;;  %s1066_s30 = smov [#allocation7]  }
  0x5d   : > { %789 = vmatprep.subr.bf16.mxu1 %v788_v5  ;;  %v794_v15 = vpack.c.bf16 %v337_v12, %v335_v11  ;;  %v796_v16 = vpack.c.bf16 %v342_v14, %v340_v13  ;;  %v339_v17 = vld [vmem:[#allocation5 + $0x40] sm:$0xff]  ;;  %v341_v18 = vld [vmem:[#allocation5 + $0x50] sm:$0xff]  ;;  %v344_v19 = vld [vmem:[#allocation5 + $0x68] sm:$0xff]  ;;  %s786_s28 = sshll.u32 %s308_s26, 3  ;;  %s1339_s26 = scalar_lea.hbm %s1395_s5, %s787_s6 }
  0x5e   : > { %791 = vmatpush1.bf16.msra.mxu1 %v790_v9  ;;  %v346_v20 = vld [vmem:[#allocation5 + $0x78] sm:$0xff]  ;;  %v798_v21 = vpack.c.bf16 %v341_v18, %v339_v17  ;;  %v343_v23 = vld [vmem:[#allocation5 + $0x60] sm:$0xff]  ;;  %v345_v24 = vld [vmem:[#allocation5 + $0x70] sm:$0xff]  ;;  %s314_s25 = scalar_lea.vmem %s1390_s0, %s786_s28  ;;  %s627_s28 = scalar_lea.sflag [#allocation4], %s1257_s12 }
  0x5f   : > { %793 = vmatprep.subr.bf16.mxu1 %v792_v10  ;;  %v800_v22 = vpack.c.bf16 %v346_v20, %v344_v19  ;;  %v348_v25 = vld [vmem:[#allocation5 + $0x88] sm:$0xff]  ;;  %v350_v26 = vld [vmem:[#allocation5 + $0x98] sm:$0xff]  ;;  %v802_v27 = vpack.c.bf16 %v345_v24, %v343_v23  ;;  %v322_v28 = vld [vmem:[%s314_s25] sm:$0xff]  ;;  %s976_s24 = sshll.u32 %s1066_s30, 4  ;;  %s977_s24 = int_to_ptr.vmem [resolvable:$false] %s976_s24 }
  0x60   : > { %v324_v29 = vld [vmem:[%s1263_s13 + $0x8] sm:$0xff]  ;;  %v804_v30 = vpack.c.bf16 %v350_v26, %v348_v25  ;;  %v347_v31 = vld [vmem:[#allocation5 + $0x80] sm:$0xff]  ;;  %v349_v32 = vld [vmem:[#allocation5 + $0x90] sm:$0xff]  ;;  %v470_v33 = vcombine.high %v322_v28, %v322_v28  ;;  %s978_s25 = scalar_lea.vmem %s977_s24, 2048 }
  0x61   : > { %770 = vmatprep.mubr.msk.f32.mxu1 %vm367_vm0, %v324_v29  ;;  %v352_v34 = vld [vmem:[#allocation5 + $0xa8] sm:$0xff]  ;;  %v354_v35 = vld [vmem:[#allocation5 + $0xb8] sm:$0xff]  ;;  %v318_v36 = vld [vmem:[%s1391_s1] sm:$0xff]  ;;  %v806_v37 = vpack.c.bf16 %v349_v32, %v347_v31 }
  0x62   : > { %795 = vmatpush1.bf16.msra.mxu1 %v794_v15  ;;  %774 = vmatprep.subr.msk.mxu0 %vm484_vm1, %v470_v33  ;;  %v578_v38 = vld [vmem:[%s1394_s4] sm:$0xff]  ;;  %v808_v39 = vpack.c.bf16 %v354_v35, %v352_v34  ;;  %v353_v41 = vld [vmem:[#allocation5 + $0xb0] sm:$0xff]  ;;  %v356_v43 = vld [vmem:[#allocation5 + $0xc8] sm:$0xff] }
  0x63   : > { %797 = vmatprep.subr.bf16.mxu1 %v796_v16  ;;  %775 = vmatpush1.msk.msra.mxu0 %vm484_vm1, %v322_v28  ;;  %v351_v40 = vld [vmem:[#allocation5 + $0xa0] sm:$0xff]  ;;  %v580_v42 = vld [vmem:[%s1394_s4 + $0x10] sm:$0xff]  ;;  %v358_v44 = vld [vmem:[#allocation5 + $0xd8] sm:$0xff] }
  0x64   : > { %776 = vmatmul.mubr.msk.f32.vlgmr.msra.gmra.mrb[0].mxu0 %vm471_vm2, %v318_v36  ;;  %v319_v45 = vld [vmem:[%s1391_s1 + $0x8] sm:$0xff]  ;;  %584 = vperm.xlu0 %911, %v578_v38   ;;  %v810_v47 = vpack.c.bf16 %v353_v41, %v351_v40  ;;  %v581_v48 = vld [vmem:[%s1394_s4 + $0x18] sm:$0xff]  ;;  %v812_v49 = vpack.c.bf16 %v358_v44, %v356_v43  ;;  %v355_v50 = vld [vmem:[#allocation5 + $0xc0] sm:$0xff] }
  0x65   : > { %559 = vmatprep.mubr.f32.mxu0 %v1064_v0  ;;  %v579_v46 = vld [vmem:[%s1394_s4 + $0x8] sm:$0xff]  ;;  %594 = vperm.xlu1 %912, %v580_v42   ;;  %v357_v51 = vld [vmem:[#allocation5 + $0xd0] sm:$0xff]  ;;  %v362_v53 = vld [vmem:[#allocation5 + $0xf8] sm:$0xff] }
  0x66   : > { %799 = vmatpush1.bf16.msra.mxu1 %v798_v21  ;;  %v360_v52 = vld [vmem:[#allocation5 + $0xe8] sm:$0xff]  ;;  %v320_v54 = vld [vmem:[%s1391_s1 + $0x10] sm:$0xff]  ;;  %v814_v55 = vpack.c.bf16 %v357_v51, %v355_v50  ;;  %v359_v57 = vld [vmem:[#allocation5 + $0xe0] sm:$0xff] }
  0x67   : > { %801 = vmatprep.subr.bf16.mxu1 %v800_v22  ;;  %v816_v56 = vpack.c.bf16 %v362_v53, %v360_v52  ;;  %v361_v58 = vld [vmem:[#allocation5 + $0xf0] sm:$0xff]  ;;  %v364_v59 = vld [vmem:[#allocation5 + $0x108] sm:$0xff]  ;;  %v366_v60 = vld [vmem:[#allocation5 + $0x118] sm:$0xff] }
  0x68   : > { %777 = vmatmul.mubr.msk.f32.gmra.mrb[2].mxu0 %vm471_vm2, %v319_v45  ;;  %589 = vperm.xlu0 %911, %v579_v46   ;;  %v321_v61 = vld [vmem:[%s1391_s1 + $0x18] sm:$0xff]  ;;  %v818_v62 = vpack.c.bf16 %v361_v58, %v359_v57  ;;  %v820_v63 = vpack.c.bf16 %v366_v60, %v364_v59  ;;  %v363_v1 = vld [vmem:[#allocation5 + $0x100] sm:$0xff]  ;;  %v365_v2 = vld [vmem:[#allocation5 + $0x110] sm:$0xff] }
  0x69   : > { %565 = vmatprep.mubr.f32.mxu0 %v1064_v0  ;;  %599 = vperm.xlu1 %912, %v581_v48   ;;  %v822_v3 = vpack.c.bf16 %v365_v2, %v363_v1  ;;  %v326_v4 = vld [vmem:[%s1263_s13 + $0x18] sm:$0xff]  ;;  %v325_v5 = vld [vmem:[%s1263_s13 + $0x10] sm:$0xff]  ;;  %v328_v6 = vld [vmem:[%s1263_s13 + $0x28] sm:$0xff] }
  0x6a   : > { %803 = vmatpush1.bf16.msra.mxu1 %v802_v27  ;;  %v327_v7 = vld [vmem:[%s1263_s13 + $0x20] sm:$0xff]  ;;  %v330_v8 = vld [vmem:[%s1263_s13 + $0x38] sm:$0xff]  ;;  %v329_v9 = vld [vmem:[%s1263_s13 + $0x30] sm:$0xff] }
  0x6b   : > { %805 = vmatprep.subr.bf16.mxu1 %v804_v30 }
  0x6c   : > { %778 = vmatmul.mubr.msk.f32.gmra.mrb[4].mxu0 %vm471_vm2, %v320_v54 }
  0x6d   : > { %571 = vmatprep.mubr.f32.mxu0 %v1064_v0  ;;  %v323_v0 = vld [vmem:[%s1263_s13] sm:$0xff]  ;;  %s1324_s13 = scalar_lea.vmem [#allocation7], %s765_s27 }
  0x6e   : > { %807 = vmatpush1.bf16.msra.mxu1 %v806_v37  ;;  %s642_s27 = sshll.u32 %s1324_s13, 4  ;;  %s1333_s27 = int_to_ptr.vmem [resolvable:$true] %s642_s27 }
  0x6f   : > { %809 = vmatprep.subr.bf16.mxu1 %v808_v39  ;;  %s972_s21 = scalar_lea.vmem %s1333_s27, 1024  ;;  %p979_p11 = scmp.lt.s32.totalorder %s1333_s27, %s977_s24 }
  0x70   : > { %779 = vmatmul.mubr.msk.f32.gmra.mrb[6].mxu0 %vm471_vm2, %v321_v61  ;;  %p973_p6 = scmp.ne.s32.totalorder %s1333_s27, %s972_s21  ;;  %p980_p0 = scmp.lt.s32.totalorder %s978_s25, %s972_s21 }
  0x72   : > { %811 = vmatpush1.bf16.msra.mxu1 %v810_v47  ;;  %p974_p8 = pnand %p973_p6, %p1198_p10  ;;  %p981_p5 = por %p980_p0, %p979_p11 }
  0x73   : > { %813 = vmatprep.subr.bf16.mxu1 %v812_v49 }
  0x74   : > { %p975_p12 = pneg %p974_p8 }
  0x76   : > { %815 = vmatpush1.bf16.msra.mxu1 %v814_v55  ;;  %p982_p9 = pnand %p981_p5, %p975_p12 }
  0x77   : > { %817 = vmatprep.subr.bf16.mxu1 %v816_v56 }
  0x7a   : > { %819 = vmatpush1.bf16.msra.mxu1 %v818_v62 }
  0x7b   : > { %821 = vmatprep.subr.bf16.mxu1 %v820_v63 }
  0x7e   : > { %823 = vmatpush1.bf16.msra.mxu1 %v822_v3 }
  0x81   : > { %445 = vmatmul.mubr.f32.vlgmr.msra.gmra.mrb[0].mxu1 %v323_v0 }
  0x82   : > { %771 = vmatprep.mubr.msk.f32.mxu1 %vm367_vm0, %v326_v4 }
  0x85   : > { %451 = vmatmul.mubr.f32.gmra.mrb[2].mxu1 %v325_v5 }
  0x86   : > { %772 = vmatprep.mubr.msk.f32.mxu1 %vm367_vm0, %v328_v6 }
  0x89   : > { %457 = vmatmul.mubr.f32.gmra.mrb[4].mxu1 %v327_v7 }
  0x8a   : > { %773 = vmatprep.mubr.msk.f32.mxu1 %vm367_vm0, %v330_v8 }
  0x8d   : > { %463 = vmatmul.mubr.f32.gmra.mrb[6].mxu1 %v329_v9 }
  0xe3   : > { %v585_v18 = vpop.permute.xlu0 %584 }
  0xe4   : > { %v595_v34 = vpop.permute.xlu1 %594 }
  0xe7   : > { %v590_v26 = vpop.permute.xlu0 %589 }
  0xe8   : > { %v600_v48 = vpop.permute.xlu1 %599 }
 0x137   : > { %v555_v10 = vpop.f32.mrb[0].mxu0 }
 0x138   : > { %v557_v11 = vpop.f32.mrb[1].mxu0 }
 0x13b   : > { %v561_v12 = vpop.f32.mrb[2].mxu0 }
 0x13c   : > { %v563_v13 = vpop.f32.mrb[3].mxu0 }
 0x13f   : > { %v567_v14 = vpop.f32.mrb[4].mxu0 }
 0x140   : > { %v569_v15 = vpop.f32.mrb[5].mxu0 }
 0x143   : > { %v573_v16 = vpop.f32.mrb[6].mxu0 }
 0x144   : > { %v575_v17 = vpop.f32.mrb[7].mxu0 }
 0x154   : > { %v446_v19 = vpop.f32.mrb[0].mxu1 }
 0x155   : > { %v556_v20 = vadd.f32 %v555_v10, %v446_v19  ;;  %v448_v21 = vpop.f32.mrb[1].mxu1 }
 0x156   : > { %v558_v22 = vadd.f32 %v557_v11, %v448_v21 }
 0x157   : > { %v602_v23 = vadd.f32 %v585_v18, %v556_v20 }
 0x158   : > { %v603_v24 = vadd.f32 %v585_v18, %v558_v22  ;;  %v452_v25 = vpop.f32.mrb[2].mxu1 }
 0x159   : > { %v610_v27 = vmax.f32 %v602_v23, 0.0  ;;  %v562_v28 = vadd.f32 %v561_v12, %v452_v25  ;;  %v454_v29 = vpop.f32.mrb[3].mxu1 }
 0x15a   : > { %v611_v30 = vmax.f32 %v603_v24, 0.0  ;;  %v564_v31 = vadd.f32 %v563_v13, %v454_v29 }
 0x15b   : > { %618 = vst [vmem:[%s1324_s13] sm:$0xff] %v610_v27  ;;  %v604_v32 = vadd.f32 %v590_v26, %v562_v28 }
 0x15c   : > { %619 = vst [vmem:[%s1324_s13 + $0x8] sm:$0xff] %v611_v30  ;;  %v605_v33 = vadd.f32 %v590_v26, %v564_v31  ;;  %v458_v35 = vpop.f32.mrb[4].mxu1 }
 0x15d   : > { %v612_v36 = vmax.f32 %v604_v32, 0.0  ;;  %v568_v37 = vadd.f32 %v567_v14, %v458_v35  ;;  %v460_v38 = vpop.f32.mrb[5].mxu1 }
 0x15e   : > { %v613_v39 = vmax.f32 %v605_v33, 0.0  ;;  %v570_v40 = vadd.f32 %v569_v15, %v460_v38 }
 0x15f   : > { %620 = vst [vmem:[%s1324_s13 + $0x10] sm:$0xff] %v612_v36  ;;  %v606_v41 = vadd.f32 %v595_v34, %v568_v37 }
 0x160   : > { %621 = vst [vmem:[%s1324_s13 + $0x18] sm:$0xff] %v613_v39  ;;  %v607_v42 = vadd.f32 %v595_v34, %v570_v40  ;;  %v464_v43 = vpop.f32.mrb[6].mxu1 }
 0x161   : > { %v614_v44 = vmax.f32 %v606_v41, 0.0  ;;  %v574_v45 = vadd.f32 %v573_v16, %v464_v43  ;;  %v466_v46 = vpop.f32.mrb[7].mxu1 }
 0x162   : > { %v615_v47 = vmax.f32 %v607_v42, 0.0  ;;  %v576_v49 = vadd.f32 %v575_v17, %v466_v46 }
 0x163   : > { %622 = vst [vmem:[%s1324_s13 + $0x20] sm:$0xff] %v614_v44  ;;  %v608_v50 = vadd.f32 %v600_v48, %v574_v45 }
 0x164   : > { %623 = vst [vmem:[%s1324_s13 + $0x28] sm:$0xff] %v615_v47  ;;  %v609_v51 = vadd.f32 %v600_v48, %v576_v49 }
 0x165   : > { %v616_v52 = vmax.f32 %v608_v50, 0.0 }
 0x166   : > { %v617_v53 = vmax.f32 %v609_v51, 0.0 }
 0x167   : > { %624 = vst [vmem:[%s1324_s13 + $0x30] sm:$0xff] %v616_v52 }
 0x168   : > { %625 = vst [vmem:[%s1324_s13 + $0x38] sm:$0xff] %v617_v53 }
 0x169   : > { %985 = shalt.err (!%p982_p9)
}
 0x16a   : > { %s986_s10 = scalar_lea.hbm %s1339_s26, 1024  ;;  %s990_s16 = scalar_lea.hbm %s1395_s5, 2048 }
 0x16b   : > { %p987_p1 = scmp.ne.s32.totalorder %s1339_s26, %s986_s10  ;;  %p991_p7 = scmp.lt.u32.totalorder %s1339_s26, %s1395_s5 }
 0x16c   : > { %p992_p13 = scmp.lt.u32.totalorder %s990_s16, %s986_s10  ;;  %p994_p6 = scmp.lt.u32.totalorder %s986_s10, %s1339_s26 }
 0x16d   : > { %p988_p2 = pnand %p987_p1, %p1198_p10 }
 0x16e   : > { %p993_p4 = por %p992_p13, %p991_p7 }
 0x16f   : > { %p989_p3 = pneg %p988_p2 }
 0x170   : > { %p995_p8 = por %p994_p6, %p993_p4 }
 0x172   : > { %p996_p12 = pnand %p995_p8, %p989_p3 }
 0x174   : > { %999 = shalt.err (!%p996_p12)
}
 0x175   : > { %s1067_s17 = smov 256   ;;  %s1068_s7 = smov 16  }
 0x176   : > { %838 = dma.vmem_to_hbm [thread:$0]  (%p1198_p10), %s1333_s27, 1024, %s1339_s26, %s627_s28, %s1067_s17, %s1067_s17, %s1068_s7  }
 0x177 PF: > { %s657_s21 = sand.u32 1, %s1038_s18   ;;  %p1415_p11 = scmp.ne.s32.totalorder %s1404_s29, 0 }
 0x178   : > { %p1416_p0 = scmp.ge.s32.totalorder %s1058_s23, 2  ;;  %s658_s30 = scalar_lea.sflag [#allocation4], %s657_s21 }
 0x17a   : > { %p849_p5 = pnand %p1416_p0, %p1415_p11 }
 0x17c   : > { %1033 = dma.done.wait (!%p849_p5), %s658_s30, 1024  }
 0x17d   : > { %1035 = vsyncadd (!%p849_p5), %s658_s30, 4294966272  ;;  %s22_s23 = sadd.s32 1, %s1058_s23   ;;  %s1417_s18 = smov %s1042_s19 }
 0x17e   : > { %p19_p9 = scmp.ge.s32.totalorder %s22_s23, 4   ;;  %s1418_s19 = smov %s1046_s20 }
 0x17f   : > { %s1419_s20 = smov %s1207_s15  ;;  %s1420_s21 = smov %s1054_s22 }
 0x180   : > { %s1421_s22 = smov %s1423_s9  ;;  %21 = sbr.rel (!%p19_p9) target bundleno = 7 (0x7), region = 93 }
 0x187   :  { %663 = vsyncpa [#allocation3], 1 }
 0x188   :  { %665 = vsyncpa [#allocation3 + $0x1], 1 }
 0x189   :  { %666 = vsyncpa [#allocation6], 1 }
 0x18a   :  { %667 = vsyncpa [#allocation4], 1 }
 0x18b   :  { %669 = vsyncpa [#allocation4 + $0x1], 1 }

</bundles_post_ra>
